<compile_context>
chip_gen: v5e
topology: v5e:2x2
jax: 0.10.0
libtpu: 0.0.40
codegen_flags: <defaults>
</compile_context>

<pallas_src>
import functools

import jax
import jax.numpy as jnp
from jax.experimental import pallas as pl
from jax.experimental.pallas import tpu as pltpu


def _round_up(x, m):
    return ((x + m - 1) // m) * m


# ----------------------------------------------------------------------------
# Pallas kernel: fused ensemble bilinear score, one batch tile per grid step.
#   q_ref : (TB, K_pad)    packed question encodings (compute dtype, MXU lhs)
#   a_ref : (TB, K_pad)    packed answer   encodings (compute dtype)
#   w_ref : (K_pad, K_pad) block-diagonal fused bilinear weights (1/M folded)
#   o_ref : (TB, 1)        averaged logits (f32) -- minimal HBM writeback
# ----------------------------------------------------------------------------
def _ensemble_score_kernel(q_ref, a_ref, w_ref, o_ref):
    # One well-filled MXU matmul over the packed model*dim axis, f32 accumulate.
    t = jnp.dot(q_ref[...], w_ref[...], preferred_element_type=jnp.float32)
    # Elementwise math in f32 (v5e VPU has no bf16); a_ref is cast lazily.
    prod = t * a_ref[...].astype(jnp.float32)
    o_ref[...] = jnp.sum(prod, axis=-1, keepdims=True)


def ensemble_scores(q_packed, a_packed, w_blk, *, tile_b=None):
    """q_packed, a_packed: (B, M*D); w_blk: (M*D, M*D) -> (B, 1) avg logits."""
    B, K = q_packed.shape
    K_pad = _round_up(K, 128)                    # fill MXU / VPU lanes
    if tile_b is None:
        tile_b = min(512, _round_up(B, 16))      # 16-row multiple (bf16 pack)
    tile_b = _round_up(tile_b, 16)
    B_pad = _round_up(B, tile_b)

    q = jnp.pad(q_packed, ((0, B_pad - B), (0, K_pad - K)))
    a = jnp.pad(a_packed, ((0, B_pad - B), (0, K_pad - K)))
    w = jnp.pad(w_blk, ((0, K_pad - K), (0, K_pad - K)))

    # Per-step VMEM: 2 inputs * 2 buffers * (tile_b*K_pad*2B) + weights
    # (<~0.6 MiB at tile_b=512) -- comfortably under every generation's
    # scoped-VMEM default, including v7x's 32/64 MiB.
    out = pl.pallas_call(
        _ensemble_score_kernel,
        out_shape=jax.ShapeDtypeStruct((B_pad, 1), jnp.float32),
        grid=(B_pad // tile_b,),
        in_specs=[
            pl.BlockSpec((tile_b, K_pad), lambda i: (i, 0)),
            pl.BlockSpec((tile_b, K_pad), lambda i: (i, 0)),
            pl.BlockSpec((K_pad, K_pad), lambda i: (0, 0)),   # resident weights
        ],
        out_specs=pl.BlockSpec((tile_b, 1), lambda i: (i, 0)),
        compiler_params=pltpu.CompilerParams(
            dimension_semantics=("parallel",)),   # both TCs on v7x for large B
    )(q, a, w)
    return out[:B]


# ----------------------------------------------------------------------------
# Glue: per-model "encoder" (embedding lookup + masked mean pool + un-sort)
# ----------------------------------------------------------------------------
def encode(tokens, lengths, idxs, emb_table):
    """tokens: (B, L) int32, lengths: (B,), idxs: (B,), emb_table: (V, D)."""
    B, L = tokens.shape
    embs = jnp.take(emb_table, tokens, axis=0)                       # (B, L, D)
    pos = jnp.arange(L, dtype=jnp.int32)[None, :]                    # (1, L)
    mask = (pos < lengths[:, None]).astype(emb_table.dtype)          # (B, L)
    summed = jnp.einsum("bld,bl->bd", embs, mask)                    # (B, D)
    pooled = summed / jnp.maximum(lengths[:, None].astype(emb_table.dtype), 1.0)
    # pack_padded_sequence un-sorting: gather by the inverse permutation
    # (TPU gathers lower far better than scatters).
    inv_idxs = jnp.argsort(idxs)
    return pooled[inv_idxs]


@functools.partial(jax.jit, static_argnames=("compute_dtype", "tile_b"))
def ensemble_de_forward(q_inputs, q_lengths, q_idxs,
                        a_inputs, a_lengths, a_idxs, params,
                        compute_dtype=jnp.bfloat16, tile_b=None):
    q_embs, a_embs, wq, wa, mbil = params
    M, _, D = q_embs.shape
    B = q_inputs.shape[0]

    # vmap the encoder over the model axis (one batched gather/pool, not M).
    enc = jax.vmap(encode, in_axes=(None, None, None, 0))
    q_enc = enc(q_inputs, q_lengths, q_idxs, q_embs)                 # (M, B, D)
    a_enc = enc(a_inputs, a_lengths, a_idxs, a_embs)                 # (M, B, D)

    # Pack the model axis into lanes -> a single MXU-sized contraction.
    q_packed = jnp.transpose(q_enc, (1, 0, 2)).reshape(B, M * D)     # (B, M*D)
    a_packed = jnp.transpose(a_enc, (1, 0, 2)).reshape(B, M * D)     # (B, M*D)

    # Pre-fuse the per-model bilinear form W_m = Wq_m @ Mbil_m @ Wa_m^T,
    # fold in the ensemble average 1/M, assemble block-diagonally.
    w_fused = jnp.einsum("mdh,mhk,mek->mde", wq, mbil, wa) / M       # (M, D, D)
    w_blk = jnp.einsum("mn,mde->mdne",
                       jnp.eye(M, dtype=w_fused.dtype), w_fused)
    w_blk = w_blk.reshape(M * D, M * D)

    # bf16 operands (bandwidth / VMEM win on v6e & v7x); kernel accumulates
    # and does all elementwise work in f32.
    q_packed = q_packed.astype(compute_dtype)
    a_packed = a_packed.astype(compute_dtype)
    w_blk = w_blk.astype(compute_dtype)

    return ensemble_scores(q_packed, a_packed, w_blk, tile_b=tile_b)  # (B, 1)


# ----------------------------------------------------------------------------
# Pure-JAX reference (mirrors the PyTorch ensemble loop exactly)
# ----------------------------------------------------------------------------
def ensemble_de_reference(q_inputs, q_lengths, q_idxs,
                          a_inputs, a_lengths, a_idxs, params):
    q_embs, a_embs, wq, wa, mbil = params
    M = q_embs.shape[0]
    B = q_inputs.shape[0]
    logits = jnp.zeros((B, 1), jnp.float32)
    for m in range(M):
        q = encode(q_inputs, q_lengths, q_idxs, q_embs[m])
        a = encode(a_inputs, a_lengths, a_idxs, a_embs[m])
        qh = q @ wq[m]
        ah = a @ wa[m]
        s = qh @ mbil[m]
        logits = logits + jnp.sum(s * ah, axis=-1, keepdims=True)
    return logits / M


if __name__ == "__main__":
    key = jax.random.PRNGKey(0)
    M = 3          # number of ensembled dual-encoder models
    B = 4          # batch
    Lq, La = 8, 8  # sequence lengths (questions / answers)
    V = 64         # vocab
    D = 32         # embedding dim
    H = 32         # hidden dim

    ks = jax.random.split(key, 16)
    # Deterministic synthetic parameters for each ensembled model.
    q_embs = 0.5 * jax.random.normal(ks[0], (M, V, D), jnp.float32)
    a_embs = 0.5 * jax.random.normal(ks[1], (M, V, D), jnp.float32)
    wq = 0.3 * jax.random.normal(ks[2], (M, D, H), jnp.float32)
    wa = 0.3 * jax.random.normal(ks[3], (M, D, H), jnp.float32)
    mbil = 0.3 * jax.random.normal(ks[4], (M, H, H), jnp.float32)
    params = (q_embs, a_embs, wq, wa, mbil)

    # Inputs (as would be fed after pack_padded-style sorting).
    q_inputs = jax.random.randint(ks[5], (B, Lq), 0, V, jnp.int32)
    a_inputs = jax.random.randint(ks[6], (B, La), 0, V, jnp.int32)
    q_lengths = jnp.array([8, 6, 5, 3], jnp.int32)
    a_lengths = jnp.array([8, 7, 4, 2], jnp.int32)
    q_idxs = jax.random.permutation(ks[7], jnp.arange(B, dtype=jnp.int32))
    a_idxs = jax.random.permutation(ks[8], jnp.arange(B, dtype=jnp.int32))

    ref = ensemble_de_reference(q_inputs, q_lengths, q_idxs,
                                a_inputs, a_lengths, a_idxs, params)

    # 1) f32 path: tight check of the kernel math (fused W, packed contraction).
    out_f32 = ensemble_de_forward(q_inputs, q_lengths, q_idxs,
                                  a_inputs, a_lengths, a_idxs, params,
                                  compute_dtype=jnp.float32)
    out_f32 = jax.block_until_ready(out_f32)
    assert out_f32.shape == (B, 1), out_f32.shape
    assert jnp.allclose(out_f32, ref, atol=1e-5, rtol=1e-4), (out_f32, ref)

    # 2) Default bf16 path: bandwidth-optimized operands, f32 accumulate.
    out_bf16 = ensemble_de_forward(q_inputs, q_lengths, q_idxs,
                                   a_inputs, a_lengths, a_idxs, params)
    out_bf16 = jax.block_until_ready(out_bf16)
    assert out_bf16.shape == (B, 1), out_bf16.shape
    assert jnp.allclose(out_bf16, ref, atol=5e-2, rtol=5e-2), (out_bf16, ref)

    # 3) Multi-tile grid + padded tail check (B=40, tile_b=16 -> 3 grid steps).
    B2 = 40
    ks2 = jax.random.split(ks[9], 6)
    q_in2 = jax.random.randint(ks2[0], (B2, Lq), 0, V, jnp.int32)
    a_in2 = jax.random.randint(ks2[1], (B2, La), 0, V, jnp.int32)
    q_len2 = jax.random.randint(ks2[2], (B2,), 1, Lq + 1, jnp.int32)
    a_len2 = jax.random.randint(ks2[3], (B2,), 1, La + 1, jnp.int32)
    q_idx2 = jax.random.permutation(ks2[4], jnp.arange(B2, dtype=jnp.int32))
    a_idx2 = jax.random.permutation(ks2[5], jnp.arange(B2, dtype=jnp.int32))
    ref2 = ensemble_de_reference(q_in2, q_len2, q_idx2,
                                 a_in2, a_len2, a_idx2, params)
    out2 = ensemble_de_forward(q_in2, q_len2, q_idx2,
                               a_in2, a_len2, a_idx2, params,
                               compute_dtype=jnp.float32, tile_b=16)
    out2 = jax.block_until_ready(out2)
    assert out2.shape == (B2, 1), out2.shape
    assert jnp.allclose(out2, ref2, atol=1e-5, rtol=1e-4), (out2, ref2)

    print("KERNEL_OK")
</pallas_src>

<mosaic_0001>
module attributes {stable_mosaic.version = 11 : i64} {
  func.func @_ensemble_score_kernel(%arg0: i32, %arg1: memref<16x128xf32, #tpu.memory_space<vmem>>, %arg2: memref<16x128xf32, #tpu.memory_space<vmem>>, %arg3: memref<128x128xf32, #tpu.memory_space<vmem>>, %arg4: memref<16x1xf32, #tpu.memory_space<vmem>>) attributes {dimension_semantics = [#tpu.dimension_semantics<parallel>], iteration_bounds = array<i64: 1>, scalar_prefetch = 0 : i64, scratch_operands = 0 : i64, tpu.core_type = #tpu.core_type<tc>, window_params = [{transform_indices = @transform_0, window_bounds = array<i64: 16, 128>}, {transform_indices = @transform_1, window_bounds = array<i64: 16, 128>}, {pipeline_mode = #tpu.pipeline_mode<synchronous>, transform_indices = @transform_2, window_bounds = array<i64: 128, 128>}, {transform_indices = @transform_3, window_bounds = array<i64: 16, 1>}]} {
    %c0 = arith.constant 0 : index
    %c0_0 = arith.constant 0 : index
    %0 = vector.load %arg1[%c0, %c0_0] : memref<16x128xf32, #tpu.memory_space<vmem>>, vector<16x128xf32>
    %c0_1 = arith.constant 0 : index
    %c0_2 = arith.constant 0 : index
    %1 = vector.load %arg3[%c0_1, %c0_2] : memref<128x128xf32, #tpu.memory_space<vmem>>, vector<128x128xf32>
    %cst = arith.constant dense<0.000000e+00> : vector<16x128xf32>
    %2 = tpu.matmul %0, %1, %cst {dimension_numbers = #tpu.dot_dimension_numbers<[1], [0], [0], [1], [0, 0, 1, 1], [], []>} : vector<16x128xf32>, vector<128x128xf32>, vector<16x128xf32> -> vector<16x128xf32>
    %c0_3 = arith.constant 0 : index
    %c0_4 = arith.constant 0 : index
    %3 = vector.load %arg2[%c0_3, %c0_4] : memref<16x128xf32, #tpu.memory_space<vmem>>, vector<16x128xf32>
    %4 = arith.mulf %2, %3 : vector<16x128xf32>
    %cst_5 = arith.constant dense<0.000000e+00> : vector<16xf32>
    %5 = vector.multi_reduction <add>, %4, %cst_5 [1] : vector<16x128xf32> to vector<16xf32>
    %6 = vector.shape_cast %5 : vector<16xf32> to vector<16x1xf32>
    %c0_6 = arith.constant 0 : index
    %c0_7 = arith.constant 0 : index
    %7 = vector.load %arg4[%c0_6, %c0_7] : memref<16x1xf32, #tpu.memory_space<vmem>>, vector<16x1xf32>
    tpu.vector_store %arg4[%c0_6, %c0_7], %6 {strides = array<i32>} : memref<16x1xf32, #tpu.memory_space<vmem>>, vector<16x1xf32>,
    return
  }
  func.func @transform_0(%arg0: i32) -> (i32, i32) {
    %c0_i32 = arith.constant 0 : i32
    %c0_i32_0 = arith.constant 0 : i32
    return %arg0, %c0_i32 : i32, i32
  }
  func.func @transform_1(%arg0: i32) -> (i32, i32) {
    %c0_i32 = arith.constant 0 : i32
    %c0_i32_0 = arith.constant 0 : i32
    return %arg0, %c0_i32 : i32, i32
  }
  func.func @transform_2(%arg0: i32) -> (i32, i32) {
    %c0_i32 = arith.constant 0 : i32
    %c0_i32_0 = arith.constant 0 : i32
    %c0_i32_1 = arith.constant 0 : i32
    return %c0_i32, %c0_i32_0 : i32, i32
  }
  func.func @transform_3(%arg0: i32) -> (i32, i32) {
    %c0_i32 = arith.constant 0 : i32
    %c0_i32_0 = arith.constant 0 : i32
    return %arg0, %c0_i32 : i32, i32
  }
}

</mosaic_0001>

<bundles_post_ra>
// kernel: ensemble_de_forward.1
= control target key start
LH: loop header
LB: loop body
LE: loop exit
PB: predicated region body
PF: predicated region fallthrough
CT: control target
= control target key end

     0   :  { %vm63_vm0 = vcmask 7168   ;;  %s172_s2 = inlined_call_operand.vmem [shape: f32[128,128], index: 2, kind: input, shape index: {}]   ;;  %s173_s0 = inlined_call_operand.vmem [shape: f32[16,128], index: 0, kind: input, shape index: {}]   ;;  %s174_s1 = inlined_call_operand.vmem [shape: f32[16,128], index: 1, kind: input, shape index: {}]   ;;  %s175_s3 = inlined_call_operand.vmem [shape: f32[16,1], index: 3, kind: output, shape index: {}]  }
   0x1   :  { %v31_v0 = vld [vmem:[%s172_s2 + $0x78] sm:$0xff]  ;;  %v30_v1 = vld [vmem:[%s172_s2 + $0x70] sm:$0xff]  ;;  %v29_v2 = vld [vmem:[%s172_s2 + $0x68] sm:$0xff] }
   0x2   :  { %32 = vmatpush.msra.mxu0 %v31_v0  ;;  %70 = vmatpush.msra.mxu1 %v31_v0  ;;  %v28_v3 = vld [vmem:[%s172_s2 + $0x60] sm:$0xff]  ;;  %v27_v4 = vld [vmem:[%s172_s2 + $0x58] sm:$0xff]  ;;  %v26_v5 = vld [vmem:[%s172_s2 + $0x50] sm:$0xff] }
   0x3   :  { %v25_v6 = vld [vmem:[%s172_s2 + $0x48] sm:$0xff]  ;;  %v24_v7 = vld [vmem:[%s172_s2 + $0x40] sm:$0xff]  ;;  %v23_v8 = vld [vmem:[%s172_s2 + $0x38] sm:$0xff] }
   0x4   :  { %33 = vmatpush.msra.mxu0 %v30_v1  ;;  %71 = vmatpush.msra.mxu1 %v30_v1  ;;  %v22_v9 = vld [vmem:[%s172_s2 + $0x30] sm:$0xff]  ;;  %v21_v10 = vld [vmem:[%s172_s2 + $0x28] sm:$0xff]  ;;  %v20_v11 = vld [vmem:[%s172_s2 + $0x20] sm:$0xff] }
   0x5   :  { %v19_v12 = vld [vmem:[%s172_s2 + $0x18] sm:$0xff]  ;;  %v18_v13 = vld [vmem:[%s172_s2 + $0x10] sm:$0xff]  ;;  %v17_v14 = vld [vmem:[%s172_s2 + $0x8] sm:$0xff] }
   0x6   :  { %34 = vmatpush.msra.mxu0 %v29_v2  ;;  %72 = vmatpush.msra.mxu1 %v29_v2  ;;  %v16_v15 = vld [vmem:[%s172_s2] sm:$0xff]  ;;  %v15_v17 = vld [vmem:[%s173_s0 + $0x8] sm:$0xff] }
   0x7   :  { %v14_v16 = vld [vmem:[%s173_s0] sm:$0xff]  ;;  %v56_v22 = vld [vmem:[%s174_s1 + $0x8] sm:$0xff] }
   0x8   :  { %35 = vmatpush.msra.mxu0 %v28_v3  ;;  %73 = vmatpush.msra.mxu1 %v28_v3  ;;  %v55_v18 = vld [vmem:[%s174_s1] sm:$0xff] }
   0xa   :  { %36 = vmatpush.msra.mxu0 %v27_v4  ;;  %74 = vmatpush.msra.mxu1 %v27_v4 }
   0xc   :  { %37 = vmatpush.msra.mxu0 %v26_v5  ;;  %75 = vmatpush.msra.mxu1 %v26_v5 }
   0xe   :  { %38 = vmatpush.msra.mxu0 %v25_v6  ;;  %76 = vmatpush.msra.mxu1 %v25_v6 }
  0x10   :  { %39 = vmatpush.msra.mxu0 %v24_v7  ;;  %77 = vmatpush.msra.mxu1 %v24_v7 }
  0x12   :  { %40 = vmatpush.msra.mxu0 %v23_v8  ;;  %78 = vmatpush.msra.mxu1 %v23_v8 }
  0x14   :  { %41 = vmatpush.msra.mxu0 %v22_v9  ;;  %79 = vmatpush.msra.mxu1 %v22_v9 }
  0x16   :  { %42 = vmatpush.msra.mxu0 %v21_v10  ;;  %80 = vmatpush.msra.mxu1 %v21_v10 }
  0x18   :  { %43 = vmatpush.msra.mxu0 %v20_v11  ;;  %81 = vmatpush.msra.mxu1 %v20_v11 }
  0x1a   :  { %44 = vmatpush.msra.mxu0 %v19_v12  ;;  %82 = vmatpush.msra.mxu1 %v19_v12 }
  0x1c   :  { %45 = vmatpush.msra.mxu0 %v18_v13  ;;  %83 = vmatpush.msra.mxu1 %v18_v13 }
  0x1e   :  { %46 = vmatpush.msra.mxu0 %v17_v14  ;;  %84 = vmatpush.msra.mxu1 %v17_v14 }
  0x20   :  { %47 = vmatpush.msra.mxu0 %v16_v15  ;;  %85 = vmatpush.msra.mxu1 %v16_v15 }
  0x21   :  { %48 = vmatmul.f32.vlgmr.msra.gmra.mxu0 %v14_v16  ;;  %51 = vmatmul.f32.vlgmr.msra.gmra.mxu1 %v15_v17 }
  0x9e   :  { %v49_v19 = vpop.f32.mrf.mxu0  ;;  %v52_v21 = vpop.f32.mrf.mxu1 }
  0x9f   :  { %v57_v20 = vmul.f32 %v55_v18, %v49_v19  ;;  %v58_v23 = vmul.f32 %v56_v22, %v52_v21 }
  0xa1   :  { %59 = vadd.xlane.f32.xlu0 %v57_v20 }
  0xa9   :  { %61 = vadd.xlane.f32.xlu0 %v58_v23 }
 0x114   :  { %v60_v24 = vpop.xlane.xlu0 %59 }
 0x115   :  { %64 = vst.msk [vmem:[%s175_s3] sm:$0xff] %vm63_vm0, %v60_v24 }
 0x11c   :  { %v62_v25 = vpop.xlane.xlu0 %61 }
 0x11d   :  { %65 = vst.msk [vmem:[%s175_s3 + $0x8] sm:$0xff] %vm63_vm0, %v62_v25 }

</bundles_post_ra>
